<compile_context>
chip_gen: v7x
topology: tpu7x:2x2x1
jax: 0.10.0
libtpu: 0.0.40
codegen_flags: <defaults>
</compile_context>

<pallas_src>
import functools

import jax
import jax.numpy as jnp
from jax.experimental import pallas as pl
from jax.experimental.pallas import tpu as pltpu

# Lane-dense output tile: one full (8, 128) f32 vreg per grid step.
_OUT_SUB, _OUT_LANE = 8, 128
_EPS = 1e-12


# --------------------------------------------------------------------------
# Kernel bodies (operate on one batch element: leading block dim == 1)
# --------------------------------------------------------------------------
def _labels_terms(logits, label, label_scale):
    """Per-batch loss_label using the lse identity (no logp/tgt materialized).

    tgt pairing from torch.cat([label[:, :1], label[:, 2:], label[:, :1]], 1):
      logits[0]      <-> label[0]
      logits[1:N-1]  <-> label[2:N]
      logits[N-1]    <-> label[0]
    """
    N = logits.shape[1]
    m = jnp.max(logits, axis=-1, keepdims=True)
    lse = m + jnp.log(jnp.sum(jnp.exp(logits - m), axis=-1, keepdims=True))  # (1,N,1)

    lab0 = label[:, 0:1, :]                                             # (1,1,C)
    tsum0 = jnp.sum(lab0, axis=-1, keepdims=True)
    cross_f = jnp.sum(logits[:, 0:1, :] * lab0, axis=-1, keepdims=True)
    cross_l = jnp.sum(logits[:, N - 1:N, :] * lab0, axis=-1, keepdims=True)

    ce = (jnp.sum(lse[:, 0:1, :] * tsum0 - cross_f)
          + jnp.sum(lse[:, N - 1:N, :] * tsum0 - cross_l))
    if N > 2:  # static
        lab_mid = label[:, 2:, :]                                       # (1,N-2,C)
        tsum_m = jnp.sum(lab_mid, axis=-1, keepdims=True)
        cross_m = jnp.sum(logits[:, 1:N - 1, :] * lab_mid, axis=-1, keepdims=True)
        ce = ce + jnp.sum(lse[:, 1:N - 1, :] * tsum_m - cross_m)
    # label_scale == 0.5 / global_bs (folded /2 and /bs, global batch size).
    return ce * label_scale


def _div_partials(a, label, eps):
    """Per-batch partial sums for loss_div: (num_a, nnz_a, num_b, nnz_b)."""
    K = label.shape[-1]
    # L2-normalize with rsqrt (EUP) + eps guard (no div-by-zero NaNs).
    ssum = jnp.sum(a * a, axis=-1, keepdims=True)
    a_n = a * jax.lax.rsqrt(ssum + eps)
    # bf16 MXU inputs, f32 accumulation.
    a_nb = a_n.astype(jnp.bfloat16)
    similar = jnp.einsum("bkd,bjd->bkj", a_nb, a_nb,
                         preferred_element_type=jnp.float32)            # (1,K,K)

    a_label = 1.0 - label
    num_a = jnp.sum((similar * a_label) ** 2)
    nnz_a = jnp.sum((a_label != 0.0).astype(jnp.float32))

    r = jax.lax.broadcasted_iota(jnp.int32, (K, K), 0)
    c = jax.lax.broadcasted_iota(jnp.int32, (K, K), 1)
    eye = (r == c).astype(jnp.float32)
    b_label = label - eye[None]
    num_b = jnp.sum(((1.0 - similar) * b_label) ** 2)
    nnz_b = jnp.sum((b_label != 0.0).astype(jnp.float32))
    return num_a, nnz_a, num_b, nnz_b


def _write_div_partials(out_ref, num_a, nnz_a, num_b, nnz_b):
    """Pack the 4 scalars into lanes 0..3 of a lane-dense (1,8,128) tile."""
    lane = jax.lax.broadcasted_iota(jnp.int32, out_ref.shape, 2)
    parts = jnp.where(lane == 0, num_a,
            jnp.where(lane == 1, nnz_a,
            jnp.where(lane == 2, num_b,
            jnp.where(lane == 3, nnz_b, 0.0))))
    out_ref[...] = parts.astype(jnp.float32)


# --------------------------------------------------------------------------
# Fused kernel: both losses, one launch, label read once.
# --------------------------------------------------------------------------
def _fused_kernel(logits_ref, label_ref, a_ref, label_out_ref, div_out_ref,
                  *, label_scale, eps):
    logits = logits_ref[...].astype(jnp.float32)   # (1, N, C)
    label = label_ref[...].astype(jnp.float32)     # (1, N, C) == (1, K, K)
    a = a_ref[...].astype(jnp.float32)             # (1, K, D)

    loss_label_b = _labels_terms(logits, label, label_scale)
    num_a, nnz_a, num_b, nnz_b = _div_partials(a, label, eps)

    label_out_ref[...] = jnp.full(label_out_ref.shape, loss_label_b,
                                  dtype=jnp.float32)
    _write_div_partials(div_out_ref, num_a, nnz_a, num_b, nnz_b)


def _combine_div_partials(parts):
    """Tiny wrapper epilogue: global count_nonzero normalisation + guards."""
    num_a = jnp.sum(parts[:, 0, 0])
    nnz_a = jnp.sum(parts[:, 0, 1])
    num_b = jnp.sum(parts[:, 0, 2])
    nnz_b = jnp.sum(parts[:, 0, 3])
    loss_a = jnp.where(nnz_a == 0.0, 0.0, num_a / jnp.maximum(nnz_a, 1.0))
    loss_b = jnp.where(nnz_b == 0.0, 0.0, num_b / jnp.maximum(nnz_b, 1.0))
    return loss_a + loss_b


@jax.jit
def fused_losses_pallas(logits, label, a_gathered):
    bs, N, C = logits.shape
    _, K, D = a_gathered.shape
    kernel = functools.partial(_fused_kernel, label_scale=0.5 / bs, eps=_EPS)
    label_out, div_parts = pl.pallas_call(
        kernel,
        out_shape=(
            jax.ShapeDtypeStruct((bs, _OUT_SUB, _OUT_LANE), jnp.float32),
            jax.ShapeDtypeStruct((bs, _OUT_SUB, _OUT_LANE), jnp.float32),
        ),
        grid=(bs,),
        in_specs=[
            pl.BlockSpec((1, N, C), lambda b: (b, 0, 0)),
            pl.BlockSpec((1, label.shape[1], label.shape[2]), lambda b: (b, 0, 0)),
            pl.BlockSpec((1, K, D), lambda b: (b, 0, 0)),
        ],
        out_specs=(
            pl.BlockSpec((1, _OUT_SUB, _OUT_LANE), lambda b: (b, 0, 0)),
            pl.BlockSpec((1, _OUT_SUB, _OUT_LANE), lambda b: (b, 0, 0)),
        ),
        compiler_params=pltpu.CompilerParams(
            dimension_semantics=("parallel",)),   # v7x: batch across both TCs
    )(logits, label, a_gathered)
    loss_label = label_out[:, 0, 0]                # [bs]
    loss_div = _combine_div_partials(div_parts)    # scalar
    return loss_label, loss_div


# --------------------------------------------------------------------------
# Standalone (non-fused) paths — same bodies, used when only one loss is
# requested.  Kept thin; the fused path is the fast path.
# --------------------------------------------------------------------------
def _labels_kernel(logits_ref, label_ref, out_ref, *, label_scale):
    logits = logits_ref[...].astype(jnp.float32)
    label = label_ref[...].astype(jnp.float32)
    v = _labels_terms(logits, label, label_scale)
    out_ref[...] = jnp.full(out_ref.shape, v, dtype=jnp.float32)


@jax.jit
def loss_labels_pallas(logits, label):
    bs, N, C = logits.shape
    out = pl.pallas_call(
        functools.partial(_labels_kernel, label_scale=0.5 / bs),
        out_shape=jax.ShapeDtypeStruct((bs, _OUT_SUB, _OUT_LANE), jnp.float32),
        grid=(bs,),
        in_specs=[
            pl.BlockSpec((1, N, C), lambda b: (b, 0, 0)),
            pl.BlockSpec((1, label.shape[1], label.shape[2]), lambda b: (b, 0, 0)),
        ],
        out_specs=pl.BlockSpec((1, _OUT_SUB, _OUT_LANE), lambda b: (b, 0, 0)),
        compiler_params=pltpu.CompilerParams(dimension_semantics=("parallel",)),
    )(logits, label)
    return out[:, 0, 0]


def _div_kernel(a_ref, label_ref, out_ref, *, eps):
    a = a_ref[...].astype(jnp.float32)
    label = label_ref[...].astype(jnp.float32)
    num_a, nnz_a, num_b, nnz_b = _div_partials(a, label, eps)
    _write_div_partials(out_ref, num_a, nnz_a, num_b, nnz_b)


@jax.jit
def loss_div_pallas(a_gathered, label):
    bs, K, D = a_gathered.shape
    parts = pl.pallas_call(
        functools.partial(_div_kernel, eps=_EPS),
        out_shape=jax.ShapeDtypeStruct((bs, _OUT_SUB, _OUT_LANE), jnp.float32),
        grid=(bs,),
        in_specs=[
            pl.BlockSpec((1, K, D), lambda b: (b, 0, 0)),
            pl.BlockSpec((1, label.shape[1], label.shape[2]), lambda b: (b, 0, 0)),
        ],
        out_specs=pl.BlockSpec((1, _OUT_SUB, _OUT_LANE), lambda b: (b, 0, 0)),
        compiler_params=pltpu.CompilerParams(dimension_semantics=("parallel",)),
    )(a_gathered, label)
    return _combine_div_partials(parts)


# --------------------------------------------------------------------------
# SetCriterion wrapper
# --------------------------------------------------------------------------
class SetCriterionPallas:
    def __init__(self, losses, temperature):
        self.losses = losses
        self.temperature = temperature

    @staticmethod
    def _gather_att(outputs, targets):
        atts = outputs["att"]                    # [bs, Natt, D]
        index = targets["index"]                 # [bs, K] int
        bs, K = index.shape
        D = atts.shape[-1]
        idx = jnp.broadcast_to(index[:, :, None], (bs, K, D))
        # NOTE: the reference's `S = atts.detach().cpu().numpy()` is dead code.
        return jnp.take_along_axis(atts, idx, axis=1)   # [bs, K, D]

    # ----- standalone losses (only used if not fused) -----
    def loss_labels(self, outputs, targets):
        return {"loss_label": loss_labels_pallas(outputs["outputs_class"],
                                                 targets["label"])}

    def loss_div(self, outputs, targets):
        a = self._gather_att(outputs, targets)
        return {"loss_div": loss_div_pallas(a, targets["label"])}

    def get_loss(self, loss, outputs, targets):
        loss_map = {"labels": self.loss_labels, "div": self.loss_div}
        assert loss in loss_map, f"do you really want to compute {loss} loss?"
        return loss_map[loss](outputs, targets)

    def forward(self, outputs, targets):
        losses = {}
        remaining = list(self.losses)
        if "labels" in remaining and "div" in remaining:
            # Fused fast path: one pallas_call, label read once.
            a = self._gather_att(outputs, targets)
            ll, ld = fused_losses_pallas(outputs["outputs_class"],
                                         targets["label"], a)
            losses["loss_label"] = ll
            losses["loss_div"] = ld
            remaining = [l for l in remaining if l not in ("labels", "div")]
        for loss in remaining:
            losses.update(self.get_loss(loss, outputs, targets))
        return losses


# --------------------------------------------------------------------------
# Pure-JAX reference (mirrors the PyTorch math) for correctness checking
# --------------------------------------------------------------------------
def _reference_losses(outputs, targets):
    logits = outputs["outputs_class"].astype(jnp.float32)
    label = targets["label"].astype(jnp.float32)
    bs = logits.shape[0]
    logp = jax.nn.log_softmax(logits, axis=-1)
    tgt = jnp.concatenate([label[:, :1], label[:, 2:], label[:, :1]], axis=1)
    loss_ce = -(logp * tgt).sum(-1) / 2.0
    loss_label = loss_ce.sum(-1) / bs

    atts = outputs["att"].astype(jnp.float32)
    index = targets["index"]
    D = atts.shape[-1]
    idx = jnp.broadcast_to(index[:, :, None], index.shape + (D,))
    a = jnp.take_along_axis(atts, idx, axis=1)
    a = a / jnp.linalg.norm(a, axis=-1, keepdims=True)
    similar = jnp.einsum("bkd,bjd->bkj", a, a)
    a_label = 1.0 - label
    loss_a = jnp.sum((similar * a_label) ** 2) / jnp.count_nonzero(a_label)
    eye = jnp.eye(label.shape[-1], dtype=label.dtype)[None]
    b_label = label - eye
    nnz_b = jnp.count_nonzero(b_label)
    loss_b = jnp.where(nnz_b == 0, 0.0,
                       jnp.sum(((1.0 - similar) * b_label) ** 2)
                       / jnp.maximum(nnz_b, 1).astype(jnp.float32))
    return loss_label, loss_a + loss_b


# --------------------------------------------------------------------------
# Demo
# --------------------------------------------------------------------------
if __name__ == "__main__":
    key = jax.random.PRNGKey(0)
    bs, N, C, Natt, D = 2, 8, 8, 16, 32
    k1, k2, k3, k4 = jax.random.split(key, 4)

    outputs = {
        "outputs_class": jax.random.normal(k1, (bs, N, C), dtype=jnp.float32),
        "att": jax.random.normal(k2, (bs, Natt, D), dtype=jnp.float32),
    }
    targets = {
        # shared by loss_labels ([bs,N,C]) and loss_div ([bs,K,K]); N == C == K
        "label": (jax.random.uniform(k3, (bs, N, N)) > 0.5).astype(jnp.float32),
        "index": jax.random.randint(k4, (bs, N), 0, Natt, dtype=jnp.int32),
    }

    criterion = SetCriterionPallas(losses=("labels", "div"), temperature=1000)
    losses = criterion.forward(outputs, targets)
    losses = jax.tree_util.tree_map(jax.block_until_ready, losses)

    ref_label, ref_div = _reference_losses(outputs, targets)
    assert losses["loss_label"].shape == (bs,)
    assert jnp.all(jnp.isfinite(losses["loss_label"]))
    assert jnp.isfinite(losses["loss_div"])
    assert jnp.allclose(losses["loss_label"], ref_label, rtol=1e-3, atol=1e-5), \
        (losses["loss_label"], ref_label)
    # bf16 MXU inputs => loose tolerance for the Gram-matrix loss
    assert jnp.allclose(losses["loss_div"], ref_div, rtol=1e-1, atol=2e-2), \
        (losses["loss_div"], ref_div)

    # also exercise the standalone (non-fused) paths
    solo = SetCriterionPallas(losses=("labels",), temperature=1000).forward(outputs, targets)
    solo.update(SetCriterionPallas(losses=("div",), temperature=1000).forward(outputs, targets))
    solo = jax.tree_util.tree_map(jax.block_until_ready, solo)
    assert jnp.allclose(solo["loss_label"], ref_label, rtol=1e-3, atol=1e-5)
    assert jnp.allclose(solo["loss_div"], ref_div, rtol=1e-1, atol=2e-2)

    print("KERNEL_OK")
</pallas_src>

<mosaic_0001>
module attributes {stable_mosaic.version = 11 : i64} {
  func.func @_fused_kernel(%arg0: i32, %arg1: memref<1x8x8xf32, #tpu.memory_space<vmem>>, %arg2: memref<1x8x8xf32, #tpu.memory_space<vmem>>, %arg3: memref<1x8x32xf32, #tpu.memory_space<vmem>>, %arg4: memref<1x8x128xf32, #tpu.memory_space<vmem>>, %arg5: memref<1x8x128xf32, #tpu.memory_space<vmem>>) attributes {dimension_semantics = [#tpu.dimension_semantics<parallel>], iteration_bounds = array<i64: 2>, scalar_prefetch = 0 : i64, scratch_operands = 0 : i64, tpu.core_type = #tpu.core_type<tc>, window_params = [{transform_indices = @transform_0, window_bounds = array<i64: 1, 8, 8>}, {transform_indices = @transform_1, window_bounds = array<i64: 1, 8, 8>}, {transform_indices = @transform_2, window_bounds = array<i64: 1, 8, 32>}, {transform_indices = @transform_3, window_bounds = array<i64: 1, 8, 128>}, {transform_indices = @transform_4, window_bounds = array<i64: 1, 8, 128>}]} {
    %c0 = arith.constant 0 : index
    %c0_0 = arith.constant 0 : index
    %c0_1 = arith.constant 0 : index
    %0 = vector.load %arg1[%c0, %c0_0, %c0_1] : memref<1x8x8xf32, #tpu.memory_space<vmem>>, vector<1x8x8xf32>
    %c0_2 = arith.constant 0 : index
    %c0_3 = arith.constant 0 : index
    %c0_4 = arith.constant 0 : index
    %1 = vector.load %arg2[%c0_2, %c0_3, %c0_4] : memref<1x8x8xf32, #tpu.memory_space<vmem>>, vector<1x8x8xf32>
    %c0_5 = arith.constant 0 : index
    %c0_6 = arith.constant 0 : index
    %c0_7 = arith.constant 0 : index
    %2 = vector.load %arg3[%c0_5, %c0_6, %c0_7] : memref<1x8x32xf32, #tpu.memory_space<vmem>>, vector<1x8x32xf32>
    %cst = arith.constant dense<0xFF800000> : vector<1x8xf32>
    %3 = vector.multi_reduction <maximumf>, %0, %cst [2] : vector<1x8x8xf32> to vector<1x8xf32>
    %4 = vector.shape_cast %3 : vector<1x8xf32> to vector<1x8x1xf32>
    %5 = vector.broadcast %4 : vector<1x8x1xf32> to vector<1x8x8xf32>
    %6 = arith.subf %0, %5 : vector<1x8x8xf32>
    %7 = math.exp %6 : vector<1x8x8xf32>
    %cst_8 = arith.constant dense<0.000000e+00> : vector<1x8xf32>
    %8 = vector.multi_reduction <add>, %7, %cst_8 [2] : vector<1x8x8xf32> to vector<1x8xf32>
    %9 = vector.shape_cast %8 : vector<1x8xf32> to vector<1x8x1xf32>
    %10 = math.log %9 : vector<1x8x1xf32>
    %11 = arith.addf %4, %10 : vector<1x8x1xf32>
    %12 = vector.extract_strided_slice %1 {offsets = [0, 0, 0], sizes = [1, 1, 8], strides = [1, 1, 1]} : vector<1x8x8xf32> to vector<1x1x8xf32>
    %cst_9 = arith.constant dense<0.000000e+00> : vector<1x1xf32>
    %13 = vector.multi_reduction <add>, %12, %cst_9 [2] : vector<1x1x8xf32> to vector<1x1xf32>
    %14 = vector.shape_cast %13 : vector<1x1xf32> to vector<1x1x1xf32>
    %15 = vector.extract_strided_slice %0 {offsets = [0, 0, 0], sizes = [1, 1, 8], strides = [1, 1, 1]} : vector<1x8x8xf32> to vector<1x1x8xf32>
    %16 = arith.mulf %15, %12 : vector<1x1x8xf32>
    %cst_10 = arith.constant dense<0.000000e+00> : vector<1x1xf32>
    %17 = vector.multi_reduction <add>, %16, %cst_10 [2] : vector<1x1x8xf32> to vector<1x1xf32>
    %18 = vector.shape_cast %17 : vector<1x1xf32> to vector<1x1x1xf32>
    %19 = vector.extract_strided_slice %0 {offsets = [0, 7, 0], sizes = [1, 1, 8], strides = [1, 1, 1]} : vector<1x8x8xf32> to vector<1x1x8xf32>
    %20 = arith.mulf %19, %12 : vector<1x1x8xf32>
    %cst_11 = arith.constant dense<0.000000e+00> : vector<1x1xf32>
    %21 = vector.multi_reduction <add>, %20, %cst_11 [2] : vector<1x1x8xf32> to vector<1x1xf32>
    %22 = vector.shape_cast %21 : vector<1x1xf32> to vector<1x1x1xf32>
    %23 = vector.extract_strided_slice %11 {offsets = [0, 0, 0], sizes = [1, 1, 1], strides = [1, 1, 1]} : vector<1x8x1xf32> to vector<1x1x1xf32>
    %24 = arith.mulf %23, %14 : vector<1x1x1xf32>
    %25 = arith.subf %24, %18 : vector<1x1x1xf32>
    %26 = vector.shape_cast %25 : vector<1x1x1xf32> to vector<1x1x1x1xf32>
    %cst_12 = arith.constant dense<0.000000e+00> : vector<1xf32>
    %27 = vector.multi_reduction <add>, %26, %cst_12 [1, 2, 3] : vector<1x1x1x1xf32> to vector<1xf32>
    %28 = vector.shape_cast %27 : vector<1xf32> to vector<1x1x1x1xf32>
    %29 = vector.extract %28[0, 0, 0, 0] : f32 from vector<1x1x1x1xf32>
    %30 = vector.extract_strided_slice %11 {offsets = [0, 7, 0], sizes = [1, 1, 1], strides = [1, 1, 1]} : vector<1x8x1xf32> to vector<1x1x1xf32>
    %31 = arith.mulf %30, %14 : vector<1x1x1xf32>
    %32 = arith.subf %31, %22 : vector<1x1x1xf32>
    %33 = vector.shape_cast %32 : vector<1x1x1xf32> to vector<1x1x1x1xf32>
    %cst_13 = arith.constant dense<0.000000e+00> : vector<1xf32>
    %34 = vector.multi_reduction <add>, %33, %cst_13 [1, 2, 3] : vector<1x1x1x1xf32> to vector<1xf32>
    %35 = vector.shape_cast %34 : vector<1xf32> to vector<1x1x1x1xf32>
    %36 = vector.extract %35[0, 0, 0, 0] : f32 from vector<1x1x1x1xf32>
    %37 = arith.addf %29, %36 : f32
    %38 = vector.extract_strided_slice %1 {offsets = [0, 2, 0], sizes = [1, 6, 8], strides = [1, 1, 1]} : vector<1x8x8xf32> to vector<1x6x8xf32>
    %cst_14 = arith.constant dense<0.000000e+00> : vector<1x6xf32>
    %39 = vector.multi_reduction <add>, %38, %cst_14 [2] : vector<1x6x8xf32> to vector<1x6xf32>
    %40 = vector.shape_cast %39 : vector<1x6xf32> to vector<1x6x1xf32>
    %41 = vector.extract_strided_slice %0 {offsets = [0, 1, 0], sizes = [1, 6, 8], strides = [1, 1, 1]} : vector<1x8x8xf32> to vector<1x6x8xf32>
    %42 = arith.mulf %41, %38 : vector<1x6x8xf32>
    %cst_15 = arith.constant dense<0.000000e+00> : vector<1x6xf32>
    %43 = vector.multi_reduction <add>, %42, %cst_15 [2] : vector<1x6x8xf32> to vector<1x6xf32>
    %44 = vector.shape_cast %43 : vector<1x6xf32> to vector<1x6x1xf32>
    %45 = vector.extract_strided_slice %11 {offsets = [0, 1, 0], sizes = [1, 6, 1], strides = [1, 1, 1]} : vector<1x8x1xf32> to vector<1x6x1xf32>
    %46 = arith.mulf %45, %40 : vector<1x6x1xf32>
    %47 = arith.subf %46, %44 : vector<1x6x1xf32>
    %48 = vector.shape_cast %47 : vector<1x6x1xf32> to vector<1x1x6x1xf32>
    %cst_16 = arith.constant dense<0.000000e+00> : vector<1xf32>
    %49 = vector.multi_reduction <add>, %48, %cst_16 [1, 2, 3] : vector<1x1x6x1xf32> to vector<1xf32>
    %50 = vector.shape_cast %49 : vector<1xf32> to vector<1x1x1x1xf32>
    %51 = vector.extract %50[0, 0, 0, 0] : f32 from vector<1x1x1x1xf32>
    %52 = arith.addf %37, %51 : f32
    %cst_17 = arith.constant 2.500000e-01 : f32
    %53 = arith.mulf %52, %cst_17 : f32
    %54 = arith.mulf %2, %2 : vector<1x8x32xf32>
    %cst_18 = arith.constant dense<0.000000e+00> : vector<1x8xf32>
    %55 = vector.multi_reduction <add>, %54, %cst_18 [2] : vector<1x8x32xf32> to vector<1x8xf32>
    %56 = vector.shape_cast %55 : vector<1x8xf32> to vector<1x8x1xf32>
    %cst_19 = arith.constant 9.99999996E-13 : f32
    %57 = vector.broadcast %cst_19 : f32 to vector<1x8x1xf32>
    %58 = arith.addf %56, %57 : vector<1x8x1xf32>
    %59 = math.rsqrt %58 : vector<1x8x1xf32>
    %60 = vector.broadcast %59 : vector<1x8x1xf32> to vector<1x8x32xf32>
    %61 = arith.mulf %2, %60 : vector<1x8x32xf32>
    %62 = arith.truncf %61 : vector<1x8x32xf32> to vector<1x8x32xbf16>
    "tpu.trace_start"() <{level = 10 : i32, message = "bkd,bjd->bkj"}> : () -> ()
    %cst_20 = arith.constant dense<0.000000e+00> : vector<1x8x8xf32>
    %63 = tpu.matmul %62, %62, %cst_20 {dimension_numbers = #tpu.dot_dimension_numbers<[2], [2], [1], [1], [0, 0, 0, 1, 1, 1], [0], [0]>} : vector<1x8x32xbf16>, vector<1x8x32xbf16>, vector<1x8x8xf32> -> vector<1x8x8xf32>
    "tpu.trace_stop"() : () -> ()
    %cst_21 = arith.constant 1.000000e+00 : f32
    %64 = vector.broadcast %cst_21 : f32 to vector<1x8x8xf32>
    %65 = arith.subf %64, %1 : vector<1x8x8xf32>
    %66 = arith.mulf %63, %65 : vector<1x8x8xf32>
    %67 = arith.mulf %66, %66 : vector<1x8x8xf32>
    %68 = vector.shape_cast %67 : vector<1x8x8xf32> to vector<1x1x8x8xf32>
    %cst_22 = arith.constant dense<0.000000e+00> : vector<1xf32>
    %69 = vector.multi_reduction <add>, %68, %cst_22 [1, 2, 3] : vector<1x1x8x8xf32> to vector<1xf32>
    %70 = vector.shape_cast %69 : vector<1xf32> to vector<1x1x1x1xf32>
    %71 = vector.extract %70[0, 0, 0, 0] : f32 from vector<1x1x1x1xf32>
    %cst_23 = arith.constant 0.000000e+00 : f32
    %72 = vector.broadcast %cst_23 : f32 to vector<1x8x8xf32>
    %73 = arith.cmpf one, %65, %72 : vector<1x8x8xf32>
    %74 = arith.extui %73 : vector<1x8x8xi1> to vector<1x8x8xi32>
    %75 = arith.sitofp %74 : vector<1x8x8xi32> to vector<1x8x8xf32>
    %76 = vector.shape_cast %75 : vector<1x8x8xf32> to vector<1x1x8x8xf32>
    %cst_24 = arith.constant dense<0.000000e+00> : vector<1xf32>
    %77 = vector.multi_reduction <add>, %76, %cst_24 [1, 2, 3] : vector<1x1x8x8xf32> to vector<1xf32>
    %78 = vector.shape_cast %77 : vector<1xf32> to vector<1x1x1x1xf32>
    %79 = vector.extract %78[0, 0, 0, 0] : f32 from vector<1x1x1x1xf32>
    %80 = tpu.iota {dimensions = array<i32: 0>} : vector<8x8xi32>
    %81 = tpu.iota {dimensions = array<i32: 1>} : vector<8x8xi32>
    %82 = arith.cmpi eq, %80, %81 : vector<8x8xi32>
    %83 = arith.extui %82 : vector<8x8xi1> to vector<8x8xi32>
    %84 = arith.sitofp %83 : vector<8x8xi32> to vector<8x8xf32>
    %85 = vector.shape_cast %84 : vector<8x8xf32> to vector<1x8x8xf32>
    %86 = arith.subf %1, %85 : vector<1x8x8xf32>
    %cst_25 = arith.constant 1.000000e+00 : f32
    %87 = vector.broadcast %cst_25 : f32 to vector<1x8x8xf32>
    %88 = arith.subf %87, %63 : vector<1x8x8xf32>
    %89 = arith.mulf %88, %86 : vector<1x8x8xf32>
    %90 = arith.mulf %89, %89 : vector<1x8x8xf32>
    %91 = vector.shape_cast %90 : vector<1x8x8xf32> to vector<1x1x8x8xf32>
    %cst_26 = arith.constant dense<0.000000e+00> : vector<1xf32>
    %92 = vector.multi_reduction <add>, %91, %cst_26 [1, 2, 3] : vector<1x1x8x8xf32> to vector<1xf32>
    %93 = vector.shape_cast %92 : vector<1xf32> to vector<1x1x1x1xf32>
    %94 = vector.extract %93[0, 0, 0, 0] : f32 from vector<1x1x1x1xf32>
    %cst_27 = arith.constant 0.000000e+00 : f32
    %95 = vector.broadcast %cst_27 : f32 to vector<1x8x8xf32>
    %96 = arith.cmpf one, %86, %95 : vector<1x8x8xf32>
    %97 = arith.extui %96 : vector<1x8x8xi1> to vector<1x8x8xi32>
    %98 = arith.sitofp %97 : vector<1x8x8xi32> to vector<1x8x8xf32>
    %99 = vector.shape_cast %98 : vector<1x8x8xf32> to vector<1x1x8x8xf32>
    %cst_28 = arith.constant dense<0.000000e+00> : vector<1xf32>
    %100 = vector.multi_reduction <add>, %99, %cst_28 [1, 2, 3] : vector<1x1x8x8xf32> to vector<1xf32>
    %101 = vector.shape_cast %100 : vector<1xf32> to vector<1x1x1x1xf32>
    %102 = vector.extract %101[0, 0, 0, 0] : f32 from vector<1x1x1x1xf32>
    %103 = vector.broadcast %53 : f32 to vector<1x8x128xf32>
    %c0_29 = arith.constant 0 : index
    %c0_30 = arith.constant 0 : index
    %c0_31 = arith.constant 0 : index
    %104 = vector.load %arg4[%c0_29, %c0_30, %c0_31] : memref<1x8x128xf32, #tpu.memory_space<vmem>>, vector<1x8x128xf32>
    tpu.vector_store %arg4[%c0_29, %c0_30, %c0_31], %103 {strides = array<i32>} : memref<1x8x128xf32, #tpu.memory_space<vmem>>, vector<1x8x128xf32>,
    %105 = tpu.iota {dimensions = array<i32: 2>} : vector<1x8x128xi32>
    %c0_i32 = arith.constant 0 : i32
    %106 = vector.broadcast %c0_i32 : i32 to vector<1x8x128xi32>
    %107 = arith.cmpi eq, %105, %106 : vector<1x8x128xi32>
    %c1_i32 = arith.constant 1 : i32
    %108 = vector.broadcast %c1_i32 : i32 to vector<1x8x128xi32>
    %109 = arith.cmpi eq, %105, %108 : vector<1x8x128xi32>
    %c2_i32 = arith.constant 2 : i32
    %110 = vector.broadcast %c2_i32 : i32 to vector<1x8x128xi32>
    %111 = arith.cmpi eq, %105, %110 : vector<1x8x128xi32>
    %c3_i32 = arith.constant 3 : i32
    %112 = vector.broadcast %c3_i32 : i32 to vector<1x8x128xi32>
    %113 = arith.cmpi eq, %105, %112 : vector<1x8x128xi32>
    %cst_32 = arith.constant 0.000000e+00 : f32
    %114 = vector.broadcast %102 : f32 to vector<1x8x128xf32>
    %115 = vector.broadcast %cst_32 : f32 to vector<1x8x128xf32>
    %116 = arith.select %113, %114, %115 : vector<1x8x128xi1>, vector<1x8x128xf32>
    %117 = vector.broadcast %94 : f32 to vector<1x8x128xf32>
    %118 = arith.select %111, %117, %116 : vector<1x8x128xi1>, vector<1x8x128xf32>
    %119 = vector.broadcast %79 : f32 to vector<1x8x128xf32>
    %120 = arith.select %109, %119, %118 : vector<1x8x128xi1>, vector<1x8x128xf32>
    %121 = vector.broadcast %71 : f32 to vector<1x8x128xf32>
    %122 = arith.select %107, %121, %120 : vector<1x8x128xi1>, vector<1x8x128xf32>
    %c0_33 = arith.constant 0 : index
    %c0_34 = arith.constant 0 : index
    %c0_35 = arith.constant 0 : index
    %123 = vector.load %arg5[%c0_33, %c0_34, %c0_35] : memref<1x8x128xf32, #tpu.memory_space<vmem>>, vector<1x8x128xf32>
    tpu.vector_store %arg5[%c0_33, %c0_34, %c0_35], %122 {strides = array<i32>} : memref<1x8x128xf32, #tpu.memory_space<vmem>>, vector<1x8x128xf32>,
    return
  }
  func.func @transform_0(%arg0: i32) -> (i32, i32, i32) {
    %c0_i32 = arith.constant 0 : i32
    %c0_i32_0 = arith.constant 0 : i32
    %c0_i32_1 = arith.constant 0 : i32
    return %arg0, %c0_i32, %c0_i32_0 : i32, i32, i32
  }
  func.func @transform_1(%arg0: i32) -> (i32, i32, i32) {
    %c0_i32 = arith.constant 0 : i32
    %c0_i32_0 = arith.constant 0 : i32
    %c0_i32_1 = arith.constant 0 : i32
    return %arg0, %c0_i32, %c0_i32_0 : i32, i32, i32
  }
  func.func @transform_2(%arg0: i32) -> (i32, i32, i32) {
    %c0_i32 = arith.constant 0 : i32
    %c0_i32_0 = arith.constant 0 : i32
    %c0_i32_1 = arith.constant 0 : i32
    return %arg0, %c0_i32, %c0_i32_0 : i32, i32, i32
  }
  func.func @transform_3(%arg0: i32) -> (i32, i32, i32) {
    %c0_i32 = arith.constant 0 : i32
    %c0_i32_0 = arith.constant 0 : i32
    %c0_i32_1 = arith.constant 0 : i32
    return %arg0, %c0_i32, %c0_i32_0 : i32, i32, i32
  }
  func.func @transform_4(%arg0: i32) -> (i32, i32, i32) {
    %c0_i32 = arith.constant 0 : i32
    %c0_i32_0 = arith.constant 0 : i32
    %c0_i32_1 = arith.constant 0 : i32
    return %arg0, %c0_i32, %c0_i32_0 : i32, i32, i32
  }
}

</mosaic_0001>

<bundles_post_ra>
// kernel: fused_losses_pallas.1
= control target key start
LH: loop header
LB: loop body
LE: loop exit
PB: predicated region body
PF: predicated region fallthrough
CT: control target
= control target key end

     0   :  { %10 = vsyncpa [#allocation3], 0  ;;  %s1120_s0 = inlined_call_operand.hbm [shape: f32[2,8,8], index: 0, kind: input, shape index: {}]   ;;  %s1121_s1 = inlined_call_operand.hbm [shape: f32[2,8,8], index: 1, kind: input, shape index: {}]   ;;  %s1122_s2 = inlined_call_operand.hbm [shape: f32[2,8,32], index: 2, kind: input, shape index: {}]   ;;  %s1123_s3 = inlined_call_operand.vmem [shape: f32[2,8,128], index: 3, kind: output, shape index: {0}]   ;;  %s1124_s4 = inlined_call_operand.vmem [shape: f32[2,8,128], index: 4, kind: output, shape index: {1}]  }
   0x1   :  { %12 = vsyncpa [#allocation3 + $0x1], 0 }
   0x2   :  { %13 = vsyncpa [#allocation5], 0 }
   0x3   :  { %15 = vsyncpa [#allocation5 + $0x1], 0  ;;  %s898_s15 = smov 0   ;;  %s900_s16 = smov 0  }
   0x4   :  { %s902_s17 = smov 0   ;;  %s904_s18 = smov 0  }
   0x5 LB: > { %s917_s19 = sadd.s32 4294967295, %s866_s18   ;;  %s920_s20 = sadd.s32 1, %s866_s18   ;;  %s866_s18 = sphi %s904_s18, %s1139_s18   ;;  %s862_s17 = sphi %s902_s17, %s1138_s17   ;;  %s858_s16 = sphi %s900_s16, %s1137_s16   ;;  %s854_s15 = sphi %s898_s15, %s1136_s15  }
   0x6   : > { %s25_s21 = ssub.s32 %s866_s18, %s920_s20  ;;  %s28_s22 = sadd.s32 1, %s862_s17 }
   0x7   : > { %p26_p0 = scmp.eq.s32.totalorder %s25_s21, 0  ;;  %p35_p1 = scmp.ne.s32.totalorder %s862_s17, %s858_s16 }
   0x8   : > { %p36_p2 = scmp.eq.s32.totalorder %s866_s18, 0  ;;  %p41_p3 = scmp.ne.s32.totalorder %s858_s16, %s854_s15 }
   0x9   : > { %s930_s23 = scalar_select %p26_p0, %s862_s17, %s28_s22  }
   0xa   : > { %p37_p4 = por %p36_p2, %p35_p1  ;;  %p42_p5 = scmp.eq.s32.totalorder %s917_s19, 0 }
   0xb   : > { %p697_p6 = scmp.lt.s32.totalorder %s866_s18, 2  ;;  %s169_s25 = sand.u32 1, %s862_s17  }
   0xc   : > { %p934_p7 = por %p42_p5, %p41_p3  ;;  %s941_s26 = sshll.u32 %s169_s25, 3 }
   0xd   : > { %s944_s27 = sshll.u32 %s866_s18, 7  ;;  %p946_p8 = pnand %p697_p6, %p37_p4 }
   0xe   : > { %s1127_s24 = scalar_select %p934_p7, 1, 0 }
   0xf   : > { %s1128_s28 = scalar_select %p946_p8, 1, 0 }
  0x10   : > { %s187_s29 = sand.u32 1, %s866_s18   ;;  %s955_s6 = scalar_lea.hbm %s1121_s1, %s944_s27 }
  0x11   : > { %s191_s7 = scalar_lea.vmem [#allocation4], %s941_s26  ;;  %s962_s9 = scalar_lea.sflag [#allocation5], %s187_s29 }
  0x12   : > { %s198_s8 = sshll.u32 %s191_s7, 4  ;;  %s738_s10 = scalar_lea.hbm %s955_s6, 128  ;;  %s959_s8 = int_to_ptr.vmem [resolvable:$true] %s198_s8 }
  0x13   : > { %p739_p11 = scmp.ne.s32.totalorder %s955_s6, %s738_s10  ;;  %p968_p12 = pneg %p946_p8 }
  0x14   : > { %s743_s14 = scalar_lea.hbm %s1121_s1, 256  ;;  %p744_p1 = scmp.lt.u32.totalorder %s955_s6, %s1121_s1 }
  0x15   : > { %p741_p13 = pnand %p968_p12, %p739_p11  ;;  %p745_p2 = scmp.lt.u32.totalorder %s743_s14, %s738_s10 }
  0x16   : > { %p747_p4 = scmp.lt.u32.totalorder %s738_s10, %s955_s6 }
  0x17   : > { %p742_p0 = pneg %p741_p13  ;;  %p746_p3 = por %p745_p2, %p744_p1 }
  0x19   : > { %p748_p5 = por %p747_p4, %p746_p3 }
  0x1b   : > { %p749_p6 = pnand %p748_p5, %p742_p0 }
  0x1d   : > { %752 = shalt.err (!%p749_p6)
}
  0x1e   : > { %s753_s22 = scalar_lea.vmem %s959_s8, 128  ;;  %s868_s29 = smov [#allocation4]  }
  0x1f   : > { %p754_p11 = scmp.ne.s32.totalorder %s959_s8, %s753_s22  ;;  %s758_s30 = sshll.u32 %s868_s29, 4  ;;  %s759_s30 = int_to_ptr.vmem [resolvable:$false] %s758_s30 }
  0x20   : > { %s760_s5 = scalar_lea.vmem %s759_s30, 256  ;;  %p761_p10 = scmp.lt.s32.totalorder %s959_s8, %s759_s30 }
  0x21   : > { %p756_p13 = pnand %p754_p11, %p968_p12  ;;  %p762_p7 = scmp.lt.s32.totalorder %s760_s5, %s753_s22 }
  0x23   : > { %p757_p9 = pneg %p756_p13  ;;  %p763_p1 = por %p762_p7, %p761_p10 }
  0x25   : > { %p764_p2 = pnand %p763_p1, %p757_p9 }
  0x27   : > { %767 = shalt.err (!%p764_p2)
}
  0x28   : > { %693 = dma.hbm_to_vmem [thread:$0]  (!%p946_p8), %s955_s6, 128, %s959_s8, %s962_s9  }
  0x29   : > { %p1130_p0 = scmp.lt.s32.totalorder %s866_s18, 3  ;;  %p1131_p3 = scmp.ge.s32.totalorder %s866_s18, 1 }
  0x2a   : > { %s1004_s13 = scalar_lea.hbm %s1120_s0, %s944_s27  ;;  %s173_s14 = scalar_lea.vmem [#allocation2], %s941_s26 }
  0x2b   : > { %p996_p4 = pnand %p1131_p3, %p1130_p0  ;;  %s180_s15 = sshll.u32 %s173_s14, 4  ;;  %s1007_s15 = int_to_ptr.vmem [resolvable:$true] %s180_s15 }
  0x2c   : > { %s1013_s18 = scalar_lea.hbm %s1122_s2, %s944_s27  ;;  %s170_s21 = scalar_lea.sflag [#allocation3], %s169_s25 }
  0x2d   : > { %s1132_s7 = scalar_select %p996_p4, 1, 0 }
  0x2e   : > { %s768_s22 = scalar_lea.hbm %s1004_s13, 128  ;;  %s773_s5 = scalar_lea.hbm %s1120_s0, 256 }
  0x2f   : > { %p769_p7 = scmp.ne.s32.totalorder %s1004_s13, %s768_s22  ;;  %p774_p5 = scmp.lt.u32.totalorder %s1004_s13, %s1120_s0 }
  0x30   : > { %p775_p6 = scmp.lt.u32.totalorder %s773_s5, %s768_s22  ;;  %p777_p13 = scmp.lt.u32.totalorder %s768_s22, %s1004_s13 }
  0x31   : > { %p771_p9 = pnand %p769_p7, %p968_p12 }
  0x32   : > { %p776_p11 = por %p775_p6, %p774_p5 }
  0x33   : > { %p772_p10 = pneg %p771_p9 }
  0x34   : > { %p778_p1 = por %p777_p13, %p776_p11 }
  0x36   : > { %p779_p2 = pnand %p778_p1, %p772_p10 }
  0x38   : > { %782 = shalt.err (!%p779_p2)
}
  0x39   : > { %s783_s25 = scalar_lea.vmem %s1007_s15, 128  ;;  %s869_s27 = smov [#allocation2]  }
  0x3a   : > { %p784_p0 = scmp.ne.s32.totalorder %s1007_s15, %s783_s25  ;;  %s788_s14 = sshll.u32 %s869_s27, 4  ;;  %s789_s14 = int_to_ptr.vmem [resolvable:$false] %s788_s14 }
  0x3b   : > { %s790_s6 = scalar_lea.vmem %s789_s14, 256  ;;  %p791_p9 = scmp.lt.s32.totalorder %s1007_s15, %s789_s14 }
  0x3c   : > { %p786_p3 = pnand %p784_p0, %p968_p12  ;;  %p792_p4 = scmp.lt.s32.totalorder %s790_s6, %s783_s25 }
  0x3e   : > { %p787_p7 = pneg %p786_p3  ;;  %p793_p5 = por %p792_p4, %p791_p9 }
  0x40   : > { %p794_p6 = pnand %p793_p5, %p787_p7 }
  0x42   : > { %797 = shalt.err (!%p794_p6)
}
  0x43   : > { %690 = dma.hbm_to_vmem [thread:$0]  (!%p946_p8), %s1004_s13, 128, %s1007_s15, %s170_s21  }
  0x44   : > { %s209_s8 = scalar_lea.vmem [#allocation6], %s941_s26  ;;  %s798_s29 = scalar_lea.hbm %s1013_s18, 128 }
  0x45   : > { %s216_s22 = sshll.u32 %s209_s8, 4  ;;  %p799_p10 = scmp.ne.s32.totalorder %s1013_s18, %s798_s29  ;;  %s217_s22 = int_to_ptr.vmem [resolvable:$true] %s216_s22 }
  0x46   : > { %s803_s10 = scalar_lea.hbm %s1122_s2, 256  ;;  %p804_p13 = scmp.lt.u32.totalorder %s1013_s18, %s1122_s2 }
  0x47   : > { %p801_p4 = pnand %p799_p10, %p968_p12  ;;  %p805_p1 = scmp.lt.u32.totalorder %s803_s10, %s798_s29 }
  0x48   : > { %p807_p0 = scmp.lt.u32.totalorder %s798_s29, %s1013_s18 }
  0x49   : > { %p802_p11 = pneg %p801_p4  ;;  %p806_p2 = por %p805_p1, %p804_p13 }
  0x4b   : > { %p808_p3 = por %p807_p0, %p806_p2 }
  0x4d   : > { %p809_p7 = pnand %p808_p3, %p802_p11 }
  0x4f   : > { %812 = shalt.err (!%p809_p7)
}
  0x50   : > { %s813_s26 = scalar_lea.vmem %s217_s22, 128  ;;  %s870_s13 = smov [#allocation6]  }
  0x51   : > { %p814_p9 = scmp.ne.s32.totalorder %s217_s22, %s813_s26  ;;  %s818_s15 = sshll.u32 %s870_s13, 4  ;;  %s819_s15 = int_to_ptr.vmem [resolvable:$false] %s818_s15 }
  0x52   : > { %s820_s21 = scalar_lea.vmem %s819_s15, 256  ;;  %p821_p10 = scmp.lt.s32.totalorder %s217_s22, %s819_s15 }
  0x53   : > { %p816_p5 = pnand %p814_p9, %p968_p12  ;;  %p822_p4 = scmp.lt.s32.totalorder %s820_s21, %s813_s26 }
  0x55   : > { %p817_p6 = pneg %p816_p5  ;;  %p823_p8 = por %p822_p4, %p821_p10 }
  0x57   : > { %p824_p1 = pnand %p823_p8, %p817_p6 }
  0x59   : > { %827 = shalt.err (!%p824_p1)
}
  0x5a   : > { %p1133_p13 = scmp.ne.s32.totalorder %s1128_s28, 0  ;;  %p1134_p11 = scmp.ne.s32.totalorder %s1132_s7, 0 }
  0x5b   : > { %s227_s11 = sand.u32 (!%p1134_p11), 1, %s858_s16   ;;  %p1135_p12 = scmp.ne.s32.totalorder (!%p1134_p11), %s1127_s24, 0 }
  0x5c   : > { %696 = dma.hbm_to_vmem [thread:$0]  (!%p1133_p13), %s1013_s18, 128, %s217_s22, %s962_s9  }
  0x5d   : > { %225 = sbr.rel (%p1134_p11) target bundleno = 712 (0x2c8), region = 32  ;;  %s648_s27 = sshll.u32 (!%p1134_p11), %s227_s11, 3 }
  0x5e   : > { %s228_s14 = scalar_lea.sflag (!%p1134_p11), [#allocation3], %s227_s11  ;;  %s231_s6 = scalar_lea.vmem (!%p1134_p11), [#allocation2], %s648_s27 }
  0x64   : > { %845 = dma.done.wait (%p1135_p12), %s228_s14, 128  }
  0x65   : > { %847 = vsyncadd (%p1135_p12), %s228_s14, 4294967168  ;;  %s236_s28 = sand.u32 1, %s917_s19   ;;  %s240_s29 = scalar_lea.vmem [#allocation4], %s648_s27 }
  0x66   : > { %s237_s8 = scalar_lea.sflag [#allocation5], %s236_s28 }
  0x67   : > { %849 = dma.done.wait (%p1135_p12), %s237_s8, 256  }
  0x68   : > { %851 = vsyncadd (%p1135_p12), %s237_s8, 4294967040  ;;  %s249_s9 = scalar_lea.vmem [#allocation6], %s648_s27  ;;  %vm373_vm0 = vcmask 261120   ;;  %v1069_v2 = vld [vmem:[%s231_s6] sm:$0xff]  ;;  %vm299_vm1 = vcmask 64512   ;;  %v871_v5 = vmov 0.0   ;;  %v450_v26 = vlaneseq }
  0x69   : > { %v298_v0 = vld [vmem:[%s249_s9] sm:$0xff]  ;;  %v300_v4 = vsel %vm299_vm1, %v1069_v2, -inf  ;;  %661 = vmatprep.subr.bf16.mxu0 %v871_v5  ;;  %vm872_vm2 = vmmov 0   ;;  %v1074_v6 = vld [vmem:[%s240_s29] sm:$0xff]  ;;  %vm347_vm3 = vcmask 63489   ;;  %vm343_vm4 = vcmask 64514  }
  0x6a   : > { %v372_v1 = vmul.f32 %v298_v0, %v298_v0  ;;  %663 = vmatprep.mubr.msk.bf16.mxu0 %vm872_vm2, %v871_v5  ;;  %v321_v7 = vrot.slane %v1074_v6, 1  ;;  %v344_v21 = vsel %vm343_vm4, %v1074_v6, 0.0  ;;  %v424_v22 = vsub.f32 1.0, %v1074_v6  ;;  %p287_p8 = scmp.lt.s32.totalorder %s917_s19, 1 }
  0x6b   : > { %v451_v27 = vshrl.u32 %v450_v26, 7  ;;  %v1085_v28 = vand.u32 127, %v450_v26  ;;  %vm359_vm8 = vcmask 5120   ;;  %vm324_vm9 = vcmask 64519  }
  0x6c   : > { %v374_v3 = vsel %vm373_vm0, %v372_v1, 0.0  ;;  %v323_v8 = vmul.f32 %v321_v7, %v1069_v2  ;;  %vm437_vm5 = vcmp.ne.f32.partialorder %v424_v22, 0.0  ;;  %vm312_vm10 = vcmask 57344   ;;  %s1141_s19 = smov (!%p287_p8, %s917_s19), 1 }
  0x6d   : > { %375 = vadd.xlane.f32.xlu0 %v374_v3  ;;  %v654_v23 = vsel %vm437_vm5, 1.0, %v871_v5  ;;  %vm454_vm6 = vcmp.eq.s32.totalorder %v451_v27, %v1085_v28  ;;  %v313_v55 = vsel %vm312_vm10, %v1074_v6, 0.0  ;;  %v316_v56 = vmul.f32 %v1074_v6, %v1069_v2  ;;  %s651_s30 = sshll.u32 %s1141_s19, 3 }
  0x6e   : > { %v348_v9 = vsel %vm347_vm3, %v323_v8, 0.0  ;;  %v440_v24 = vsel %vm299_vm1, %v654_v23, 0.0  ;;  %v655_v31 = vsel %vm454_vm6, 1.0, %v871_v5  ;;  %v325_v43 = vsel %vm324_vm9, %v323_v8, 0.0  ;;  %s290_s13 = scalar_lea.vmem %s1123_s3, %s651_s30  ;;  %s294_s14 = scalar_lea.vmem %s1124_s4, %s651_s30 }
  0x6f   : > { %v457_v35 = vsub.f32 %v1074_v6, %v655_v31  ;;  %v317_v57 = vsel %vm312_vm10, %v316_v56, 0.0  ;;  %vm489_vm11 = vcmp.eq.s32.totalorder %v1085_v28, 3  ;;  %vm488_vm12 = vcmp.eq.s32.totalorder %v1085_v28, 2 }
  0x70   : > { %vm487_vm13 = vcmp.eq.s32.totalorder %v1085_v28, 1  ;;  %vm486_vm14 = vcmp.eq.s32.totalorder %v1085_v28, 0 }
  0x71   : > { %301 = vmax.xlane.f32.xlu0 %v300_v4  ;;  %vm471_vm7 = vcmp.ne.f32.partialorder %v457_v35, 0.0 }
  0x72   : > { %v656_v40 = vsel %vm471_vm7, 1.0, %v871_v5 }
  0x73   : > { %v474_v42 = vsel %vm299_vm1, %v656_v40, 0.0 }
  0x75   : > { %349 = vadd.xlane.f32.xlu0 %v348_v9 }
  0xfa   : > { %v376_v10 = vpop.xlane.xlu0 %375 }
  0xfb   : > { %v377_v11 = vadd.f32 1e-12, %v376_v10 }
  0xfd   : > { %732 = vrsqrt.f32 %v377_v11 }
  0xfe   : > { %v302_v12 = vpop.xlane.xlu0 %301 }
  0xff   : > { %v303_v13 = vsub.f32 %v1069_v2, %v302_v12 }
 0x101   : > { %v304_v14 = vmul.f32 1.442695, %v303_v13 }
 0x102   : > { %v350_v36 = vpop.xlane.xlu0 %349 }
 0x103   : > { %734 = vpow2.f32 %v304_v14 }
 0x107   : > { %v733_v15 = vpop.eup %732 }
 0x108   : > { %v379_v16 = vmul.f32 %v733_v15, %v298_v0 }
 0x10a   : > { %v380_v17 = vpack.c.bf16 %v379_v16, %v379_v16 }
 0x10c   : > { %v382_v18 = vsel %vm373_vm0, %v380_v17, 0 }
 0x10d   : > { %v735_v19 = vpop.eup %734  ;;  %662 = vmatpush3.bf16.xpose.msra.mxu0 %v382_v18 }
 0x10e   : > { %v306_v20 = vsel %vm299_vm1, %v735_v19, 0.0 }
 0x10f   : > { %307 = vadd.xlane.f32.xlu1 %v306_v20 }
 0x113   : > { %345 = vadd.xlane.f32.xlu1 %v344_v21 }
 0x114   : > { %664 = vmatmul.mubr.msk.bf16.vlgmr.msra.gmra.mrb[0].mxu0 %vm373_vm0, %v380_v17 }
 0x117   : > { %441 = vadd.xlane.f32.xlu1 %v440_v24 }
 0x19c   : > { %v308_v25 = vpop.xlane.xlu1 %307 }
 0x19d   : > { %736 = vlog2.f32 %v308_v25 }
 0x1a0   : > { %v346_v29 = vpop.xlane.xlu1 %345 }
 0x1a1   : > { %v352_v33 = vrot.slane %v346_v29, 1 }
 0x1a4   : > { %v442_v58 = vpop.xlane.xlu1 %441 }
 0x1a5   : > { %v443_v62 = vrot.slane %v442_v58, 4 }
 0x1a7   : > { %v737_v30 = vpop.eup %736  ;;  %v444_v4 = vadd.f32 %v443_v62, %v442_v58 }
 0x1a8   : > { %v310_v32 = vmul.f32 0.6931472, %v737_v30 }
 0x1a9   : > { %v445_v2 = vrot.slane %v444_v4, 2 }
 0x1aa   : > { %v311_v34 = vadd.f32 %v310_v32, %v302_v12 }
 0x1ab   : > { %v446_v19 = vadd.f32 %v445_v2, %v444_v4 }
 0x1ac   : > { %v354_v37 = vmul.f32 %v352_v33, %v311_v34 }
 0x1ad   : > { %v447_v31 = vrot.slane %v446_v19, 1 }
 0x1ae   : > { %v355_v38 = vsub.f32 %v354_v37, %v350_v36 }
 0x1b0   : > { %v357_v39 = vrot.slane %v355_v38, 1 }
 0x1b2   : > { %v360_v41 = vsel %vm359_vm8, %v357_v39, 0.0 }
 0x1b3   : > { %361 = vadd.xlane.f32.xlu1 %v360_v41 }
 0x1b7   : > { %475 = vadd.xlane.f32.xlu1 %v474_v42 }
 0x1bb   : > { %326 = vadd.xlane.f32.xlu1 %v325_v43 }
 0x1e7   : > { %v418_v44 = vpop.f32.mrb[0].mxu0 }
 0x1e8   : > { %v425_v45 = vmul.f32 %v424_v22, %v418_v44  ;;  %v458_v46 = vsub.f32 1.0, %v418_v44  ;;  %v665_v47 = vpop.f32.mrb[1].mxu0 }
 0x1e9   : > { %v421_v48 = vpop.f32.mrb[2].mxu0 }
 0x1ea   : > { %v426_v49 = vmul.f32 %v425_v45, %v425_v45  ;;  %v666_v50 = vpop.f32.mrb[3].mxu0  ;;  %v459_v51 = vmul.f32 %v458_v46, %v457_v35 }
 0x1ec   : > { %v427_v52 = vsel %vm299_vm1, %v426_v49, 0.0  ;;  %v460_v53 = vmul.f32 %v459_v51, %v459_v51 }
 0x1ed   : > { %428 = vadd.xlane.f32.xlu0 %v427_v52 }
 0x1ee   : > { %v461_v54 = vsel %vm299_vm1, %v460_v53, 0.0 }
 0x1f1   : > { %462 = vadd.xlane.f32.xlu0 %v461_v54 }
 0x1f5   : > { %314 = vadd.xlane.f32.xlu0 %v313_v55 }
 0x1f9   : > { %318 = vadd.xlane.f32.xlu0 %v317_v57 }
 0x240   : > { %v362_v59 = vpop.xlane.xlu1 %361 }
 0x241   : > { %v363_v60 = vrot.slane %v362_v59, 4 }
 0x243   : > { %v364_v63 = vadd.f32 %v363_v60, %v362_v59 }
 0x244   : > { %v476_v61 = vpop.xlane.xlu1 %475 }
 0x245   : > { %v477_v0 = vrot.slane %v476_v61, 4  ;;  %v365_v7 = vrot.slane %v364_v63, 2 }
 0x247   : > { %v478_v8 = vadd.f32 %v477_v0, %v476_v61  ;;  %v366_v14 = vadd.f32 %v365_v7, %v364_v63 }
 0x248   : > { %v327_v18 = vpop.xlane.xlu1 %326 }
 0x249   : > { %v479_v12 = vrot.slane %v478_v8, 2  ;;  %v367_v24 = vrot.slane %v366_v14, 1 }
 0x24b   : > { %v480_v25 = vadd.f32 %v479_v12, %v478_v8  ;;  %v368_v33 = vadd.f32 %v367_v24, %v366_v14 }
 0x24d   : > { %v481_v35 = vrot.slane %v480_v25, 1 }
 0x24f   : > { %v482_v38 = vadd.f32 %v481_v35, %v480_v25 }
 0x27a   : > { %v429_v1 = vpop.xlane.xlu0 %428 }
 0x27b   : > { %v430_v3 = vrot.slane %v429_v1, 4 }
 0x27d   : > { %v431_v5 = vadd.f32 %v430_v3, %v429_v1 }
 0x27e   : > { %v463_v9 = vpop.xlane.xlu0 %462 }
 0x27f   : > { %v432_v10 = vrot.slane %v431_v5, 2  ;;  %v464_v11 = vrot.slane %v463_v9, 4 }
 0x281   : > { %v465_v6 = vadd.f32 %v464_v11, %v463_v9  ;;  %v433_v17 = vadd.f32 %v432_v10, %v431_v5 }
 0x282   : > { %v315_v13 = vpop.xlane.xlu0 %314 }
 0x283   : > { %v466_v15 = vrot.slane %v465_v6, 2  ;;  %v333_v16 = vrot.slane %v315_v13, 1  ;;  %v328_v20 = vmul.f32 %v315_v13, %v311_v34  ;;  %v434_v29 = vrot.slane %v433_v17, 1 }
 0x285   : > { %v335_v21 = vmul.f32 %v333_v16, %v311_v34  ;;  %v467_v22 = vadd.f32 %v466_v15, %v465_v6  ;;  %v435_v36 = vadd.f32 %v434_v29, %v433_v17  ;;  %v448_v34 = vadd.f32 %v447_v31, %v446_v19 }
 0x286   : > { %v319_v23 = vpop.xlane.xlu0 %318 }
 0x287   : > { %v336_v26 = vsub.f32 %v335_v21, %v327_v18  ;;  %v329_v27 = vsub.f32 %v328_v20, %v319_v23  ;;  %v468_v30 = vrot.slane %v467_v22, 1 }
 0x289   : > { %v339_v32 = vrot.slane %v336_v26, 7  ;;  %667 = vpush %v329_v27  ;;  %v469_v37 = vadd.f32 %v468_v30, %v467_v22 }
 0x28b   : > { %669 = vpush %v339_v32 }
 0x28c   : > { %671 = vpush %v368_v33 }
 0x28d   : > { %673 = vpush %v435_v36 }
 0x28e   : > { %675 = vpush %v448_v34 }
 0x28f   : > { %677 = vpush %v469_v37 }
 0x290   : > { %679 = vpush %v482_v38 }
 0x2ba   : > { %s668_s24 = spop %667 }
 0x2bc   : > { %s670_s7 = spop %669 }
 0x2bd   : > { %s342_s18 = sadd.f32 %s670_s7, %s668_s24  ;;  %s672_s22 = spop %671 }
 0x2be   : > { %s674_s5 = spop %673 }
 0x2bf   : > { %s370_s10 = sadd.f32 %s672_s22, %s342_s18  ;;  %s676_s12 = spop %675  ;;  %v496_v45 = vstv %s674_s5 }
 0x2c0   : > { %s678_s15 = spop %677  ;;  %v494_v43 = vstv %s676_s12 }
 0x2c1   : > { %s371_s21 = smul.f32 0.25, %s370_s10  ;;  %v492_v39 = vstv %s678_s15  ;;  %s680_s11 = spop %679 }
 0x2c2   : > { %v490_v40 = vstv %s680_s11 }
 0x2c3   : > { %v484_v41 = vstv %s371_s21  ;;  %v491_v42 = vsel %vm489_vm11, %v490_v40, 0.0 }
 0x2c4   : > { %485 = vst [vmem:[%s290_s13] sm:$0xff] %v484_v41  ;;  %v493_v44 = vsel %vm488_vm12, %v492_v39, %v491_v42 }
 0x2c5   : > { %v495_v46 = vsel %vm487_vm13, %v494_v43, %v493_v44 }
 0x2c6   : > { %v497_v47 = vsel %vm486_vm14, %v496_v45, %v495_v46 }
 0x2c7   : > { %498 = vst [vmem:[%s294_s14] sm:$0xff] %v497_v47 }
 0x2c8 PF: > { %p18_p2 = scmp.ge.s32.totalorder %s920_s20, 4   ;;  %s1136_s15 = smov %s858_s16 }
 0x2c9   : > { %s1137_s16 = smov %s862_s17  ;;  %s1138_s17 = smov %s930_s23 }
 0x2ca   : > { %s1139_s18 = smov %s920_s20  ;;  %20 = sbr.rel (!%p18_p2) target bundleno = 5 (0x5), region = 108 }
 0x2d1   :  { %532 = vsyncpa [#allocation3], 1 }
 0x2d2   :  { %534 = vsyncpa [#allocation3 + $0x1], 1 }
 0x2d3   :  { %535 = vsyncpa [#allocation5], 1 }
 0x2d4   :  { %537 = vsyncpa [#allocation5 + $0x1], 1 }

</bundles_post_ra>
